<compile_context>
chip_gen: v7x
topology: tpu7x:2x2x1
jax: 0.10.0
libtpu: 0.0.40
codegen_flags: <defaults>
</compile_context>

<pallas_src>
import math

import jax
import jax.numpy as jnp
from jax.experimental import pallas as pl
from jax.experimental.pallas import tpu as pltpu


def z_block_kernel(x_ref, d_ref, theta_ref, o_ref):
    # Elementwise hot path: relu(x - d - theta).  theta block is (1, L) and
    # broadcasts over the row (sublane) axis.
    o_ref[...] = jnp.maximum(x_ref[...] - d_ref[...] - theta_ref[...], 0.0)


def _vmem_limit_bytes():
    """Generation-aware scoped-VMEM budget (half of physical, <= 64 MiB)."""
    try:
        cap = getattr(pltpu.get_tpu_info(), "vmem_capacity_bytes", None)
        if cap:
            return int(min(cap // 2, 64 * 1024 * 1024))
    except Exception:
        pass
    return 32 * 1024 * 1024  # safe on v5e / v6e / v7x


def z_block_forward(x, d, theta, *, force_pallas=False, min_pallas_bytes=256 * 1024):
    """relu(x - d - theta) with theta of shape (p,) broadcast over the last axis."""
    assert x.shape == d.shape, "x and d must have identical shapes"
    p = x.shape[-1]
    assert theta.shape == (p,), "theta must have shape (p,) matching the last axis of x"

    theta = theta.astype(x.dtype)  # exact parity when x/d are bf16 etc.
    orig_shape = x.shape
    total = x.size
    itemsize = jnp.dtype(x.dtype).itemsize

    # --- tiny-input bypass -------------------------------------------------
    # Pallas launch + pipeline prologue/epilogue costs multiple microseconds;
    # for tiny ADMMNet layers a fused XLA elementwise is strictly faster.
    if not force_pallas and total * itemsize < min_pallas_bytes:
        return jnp.maximum(x - d - theta, 0.0).astype(x.dtype)

    # --- lane-dense layout via pad-to-lcm(p, 128) ---------------------------
    base = (p * 128) // math.gcd(p, 128)  # lcm(p, 128)
    if base <= 8192:
        L = base * max(1, 1024 // base)   # widen toward ~1024 lanes
        rows = -(-total // L)             # cdiv
        pad = rows * L - total
        xf = x.reshape(-1)
        df = d.reshape(-1)
        if pad:
            xf = jnp.pad(xf, (0, pad))
            df = jnp.pad(df, (0, pad))
        x2 = xf.reshape(rows, L)
        d2 = df.reshape(rows, L)
        # Every slab row starts at a flat offset divisible by p, so a theta
        # tiled to width L broadcasts identically to the original (..., p).
        theta2 = jnp.tile(theta, L // p).reshape(1, L)
    else:
        # Rare: very large p with huge lcm.  p already spans many lanes, so
        # the plain (rows, p) layout is acceptable (only tail lanes masked).
        L = p
        x2 = x.reshape(-1, p)
        d2 = d.reshape(-1, p)
        rows = x2.shape[0]
        pad = 0
        theta2 = theta.reshape(1, p)

    # --- row-tile selection --------------------------------------------------
    sub_align = max(8, 32 // itemsize)    # f32: 8, bf16: 16, int8/fp8: 32
    vmem_limit = _vmem_limit_bytes()
    per_stream_cap = vmem_limit // 8      # 3 streams x 2 buffers + headroom
    bytes_per_row = L * itemsize
    max_rows_by_vmem = max(sub_align, per_stream_cap // max(bytes_per_row, 1))

    tm = min(rows, max_rows_by_vmem)

    # Guarantee >= 2 grid steps for non-tiny problems so ("parallel",) can
    # shard the grid across both v7x TensorCores.
    if rows * bytes_per_row >= (1 << 20) and rows > 2 * sub_align:
        half = -(-rows // 2)
        half = -(-half // sub_align) * sub_align
        tm = min(tm, half)

    if tm < rows:
        tm = max(sub_align, (tm // sub_align) * sub_align)
    grid = (pl.cdiv(rows, tm),)           # boundary block padded/masked by Pallas

    out = pl.pallas_call(
        z_block_kernel,
        out_shape=jax.ShapeDtypeStruct((rows, L), x2.dtype),
        grid_spec=pltpu.PrefetchScalarGridSpec(
            num_scalar_prefetch=0,
            grid=grid,
            in_specs=[
                pl.BlockSpec((tm, L), lambda i: (i, 0)),  # x tile
                pl.BlockSpec((tm, L), lambda i: (i, 0)),  # d tile
                pl.BlockSpec((1, L), lambda i: (0, 0)),   # theta (resident, lane-dense)
            ],
            out_specs=pl.BlockSpec((tm, L), lambda i: (i, 0)),
        ),
        compiler_params=pltpu.CompilerParams(
            dimension_semantics=("parallel",),
            vmem_limit_bytes=vmem_limit,
        ),
    )(x2, d2, theta2)

    if pad:
        out = out.reshape(-1)[:total]
    return out.reshape(orig_shape)


if __name__ == "__main__":
    theta_init = 0.1  # deterministic parameter init: theta = theta_init * ones(p)
    key = jax.random.PRNGKey(0)
    kx, kd = jax.random.split(key)

    # 1) Small shape consistent with Z_block usage (p endmembers on last axis),
    #    forced through the Pallas lane-dense path.
    B, N, p = 2, 64, 8
    x = jax.random.normal(kx, (B, N, p), dtype=jnp.float32)
    d = jax.random.normal(kd, (B, N, p), dtype=jnp.float32)
    theta = jnp.full((p,), theta_init, dtype=jnp.float32)

    out = jax.block_until_ready(z_block_forward(x, d, theta, force_pallas=True))
    ref = jnp.maximum(x - d - theta, 0.0)
    assert out.shape == x.shape
    assert jnp.allclose(out, ref, atol=1e-6), "mismatch (lane-dense Pallas path)"

    # 2) Same inputs through the default path (tiny-input XLA bypass).
    out_bypass = jax.block_until_ready(z_block_forward(x, d, theta))
    assert jnp.allclose(out_bypass, ref, atol=1e-6), "mismatch (bypass path)"

    # 3) p not a divisor of 128 and irregular element count -> exercises the
    #    pad-to-lcm(p, 128) path.
    x3 = jax.random.normal(kx, (3, 5, 6), dtype=jnp.float32)
    d3 = jax.random.normal(kd, (3, 5, 6), dtype=jnp.float32)
    theta3 = jnp.full((6,), theta_init, dtype=jnp.float32)
    out3 = jax.block_until_ready(z_block_forward(x3, d3, theta3, force_pallas=True))
    ref3 = jnp.maximum(x3 - d3 - theta3, 0.0)
    assert jnp.allclose(out3, ref3, atol=1e-6), "mismatch (padded lane-dense path)"

    # 4) Moderately sized input (>= 1 MiB) -> multi-step grid / 2-TC split path.
    xl = jax.random.normal(kx, (2, 16384, 8), dtype=jnp.float32)
    dl = jax.random.normal(kd, (2, 16384, 8), dtype=jnp.float32)
    outl = jax.block_until_ready(z_block_forward(xl, dl, theta))
    refl = jnp.maximum(xl - dl - theta, 0.0)
    assert jnp.allclose(outl, refl, atol=1e-6), "mismatch (multi-step grid path)"

    # 5) bf16 check: sublane alignment (16) and theta cast parity.
    xb = x.astype(jnp.bfloat16)
    db = d.astype(jnp.bfloat16)
    outb = jax.block_until_ready(z_block_forward(xb, db, theta, force_pallas=True))
    refb = jnp.maximum(xb - db - theta.astype(jnp.bfloat16), 0.0)
    assert jnp.allclose(outb.astype(jnp.float32), refb.astype(jnp.float32),
                        atol=1e-2), "mismatch (bf16 path)"

    print("KERNEL_OK")
</pallas_src>

<mosaic_0001>
module attributes {stable_mosaic.version = 11 : i64} {
  func.func @z_block_kernel(%arg0: i32, %arg1: memref<1x1024xf32, #tpu.memory_space<vmem>>, %arg2: memref<1x1024xf32, #tpu.memory_space<vmem>>, %arg3: memref<1x1024xf32, #tpu.memory_space<vmem>>, %arg4: memref<1x1024xf32, #tpu.memory_space<vmem>>) attributes {dimension_semantics = [#tpu.dimension_semantics<parallel>], iteration_bounds = array<i64: 1>, scalar_prefetch = 0 : i64, scratch_operands = 0 : i64, tpu.core_type = #tpu.core_type<tc>, window_params = [{transform_indices = @transform_0, window_bounds = array<i64: 1, 1024>}, {transform_indices = @transform_1, window_bounds = array<i64: 1, 1024>}, {pipeline_mode = #tpu.pipeline_mode<synchronous>, transform_indices = @transform_2, window_bounds = array<i64: 1, 1024>}, {transform_indices = @transform_3, window_bounds = array<i64: 1, 1024>}]} {
    %c0 = arith.constant 0 : index
    %c0_0 = arith.constant 0 : index
    %0 = vector.load %arg1[%c0, %c0_0] : memref<1x1024xf32, #tpu.memory_space<vmem>>, vector<1x1024xf32>
    %c0_1 = arith.constant 0 : index
    %c0_2 = arith.constant 0 : index
    %1 = vector.load %arg2[%c0_1, %c0_2] : memref<1x1024xf32, #tpu.memory_space<vmem>>, vector<1x1024xf32>
    %2 = arith.subf %0, %1 : vector<1x1024xf32>
    %c0_3 = arith.constant 0 : index
    %c0_4 = arith.constant 0 : index
    %3 = vector.load %arg3[%c0_3, %c0_4] : memref<1x1024xf32, #tpu.memory_space<vmem>>, vector<1x1024xf32>
    %4 = arith.subf %2, %3 : vector<1x1024xf32>
    %cst = arith.constant 0.000000e+00 : f32
    %5 = vector.broadcast %cst : f32 to vector<1x1024xf32>
    %6 = arith.maximumf %4, %5 : vector<1x1024xf32>
    %c0_5 = arith.constant 0 : index
    %c0_6 = arith.constant 0 : index
    %7 = vector.load %arg4[%c0_5, %c0_6] : memref<1x1024xf32, #tpu.memory_space<vmem>>, vector<1x1024xf32>
    tpu.vector_store %arg4[%c0_5, %c0_6], %6 {strides = array<i32>} : memref<1x1024xf32, #tpu.memory_space<vmem>>, vector<1x1024xf32>,
    return
  }
  func.func @transform_0(%arg0: i32) -> (i32, i32) {
    %c0_i32 = arith.constant 0 : i32
    %c0_i32_0 = arith.constant 0 : i32
    return %arg0, %c0_i32 : i32, i32
  }
  func.func @transform_1(%arg0: i32) -> (i32, i32) {
    %c0_i32 = arith.constant 0 : i32
    %c0_i32_0 = arith.constant 0 : i32
    return %arg0, %c0_i32 : i32, i32
  }
  func.func @transform_2(%arg0: i32) -> (i32, i32) {
    %c0_i32 = arith.constant 0 : i32
    %c0_i32_0 = arith.constant 0 : i32
    %c0_i32_1 = arith.constant 0 : i32
    return %c0_i32, %c0_i32_0 : i32, i32
  }
  func.func @transform_3(%arg0: i32) -> (i32, i32) {
    %c0_i32 = arith.constant 0 : i32
    %c0_i32_0 = arith.constant 0 : i32
    return %arg0, %c0_i32 : i32, i32
  }
}

</mosaic_0001>

<bundles_post_ra>
// kernel: tpu_custom_call.1
= control target key start
LH: loop header
LB: loop body
LE: loop exit
PB: predicated region body
PF: predicated region fallthrough
CT: control target
= control target key end

     0   :  { %8 = vsyncpa [#allocation3], 0  ;;  %s243_s0 = inlined_call_operand.hbm [shape: f32[1,1024], index: 0, kind: input, shape index: {}]   ;;  %s244_s1 = inlined_call_operand.hbm [shape: f32[1,1024], index: 1, kind: input, shape index: {}]   ;;  %s245_s2 = inlined_call_operand.hbm [shape: f32[1,1024], index: 2, kind: input, shape index: {}]   ;;  %s246_s3 = inlined_call_operand.hbm [shape: f32[1,1024], index: 3, kind: output, shape index: {}]  }
   0x1   :  { %9 = vsyncpa [#allocation6], 0 }
   0x2   :  { %10 = vsyncpa [#allocation4], 0  ;;  %s171_s12 = smov [#allocation5]   ;;  %s172_s14 = smov [#allocation2]  }
   0x3   :  { %s27_s13 = sshll.u32 %s171_s12, 4  ;;  %s17_s15 = sshll.u32 %s172_s14, 4  ;;  %s28_s13 = int_to_ptr.vmem [resolvable:$true] %s27_s13  ;;  %s18_s15 = int_to_ptr.vmem [resolvable:$true] %s17_s15 }
   0x4   :  { %s77_s18 = scalar_lea.hbm %s244_s1, 128 }
   0x5   :  { %p78_p0 = scmp.ne.s32.totalorder %s244_s1, %s77_s18  ;;  %p81_p1 = scmp.lt.u32.totalorder %s77_s18, %s244_s1 }
   0x7   :  { %p83_p2 = pnand %p81_p1, %p78_p0 }
   0x9   :  { %86 = shalt.err (!%p83_p2)
}
   0xa   :  { %s87_s23 = scalar_lea.vmem %s28_s13, 128  ;;  %p92_p4 = scmp.lt.s32.totalorder %s28_s13, %s28_s13 }
   0xb   :  { %p88_p3 = scmp.ne.s32.totalorder %s28_s13, %s87_s23  ;;  %p93_p5 = scmp.lt.s32.totalorder %s87_s23, %s87_s23 }
   0xd   :  { %p94_p6 = por %p93_p5, %p92_p4 }
   0xf   :  { %p95_p7 = pnand %p94_p6, %p88_p3 }
  0x11   :  { %98 = shalt.err (!%p95_p7)
}
  0x12   :  { %30 = dma.hbm_to_vmem [thread:$0]  %s244_s1, 128, %s28_s13, [#allocation6]  }
  0x13   :  { %s99_s28 = scalar_lea.hbm %s243_s0, 128 }
  0x14   :  { %p100_p8 = scmp.ne.s32.totalorder %s243_s0, %s99_s28  ;;  %p103_p9 = scmp.lt.u32.totalorder %s99_s28, %s243_s0 }
  0x16   :  { %p105_p10 = pnand %p103_p9, %p100_p8 }
  0x18   :  { %108 = shalt.err (!%p105_p10)
}
  0x19   :  { %s109_s6 = scalar_lea.vmem %s18_s15, 128  ;;  %p114_p12 = scmp.lt.s32.totalorder %s18_s15, %s18_s15 }
  0x1a   :  { %p110_p11 = scmp.ne.s32.totalorder %s18_s15, %s109_s6  ;;  %p115_p13 = scmp.lt.s32.totalorder %s109_s6, %s109_s6 }
  0x1c   :  { %p116_p0 = por %p115_p13, %p114_p12 }
  0x1e   :  { %p117_p1 = pnand %p116_p0, %p110_p11 }
  0x20   :  { %120 = shalt.err (!%p117_p1)
}
  0x21   :  { %20 = dma.hbm_to_vmem [thread:$0]  %s243_s0, 128, %s18_s15, [#allocation3]  }
  0x22   :  { %s173_s8 = smov [#allocation7]   ;;  %s121_s12 = scalar_lea.hbm %s245_s2, 128 }
  0x23   :  { %s37_s9 = sshll.u32 %s173_s8, 4  ;;  %p122_p2 = scmp.ne.s32.totalorder %s245_s2, %s121_s12  ;;  %s38_s9 = int_to_ptr.vmem [resolvable:$true] %s37_s9 }
  0x24   :  { %p125_p3 = scmp.lt.u32.totalorder %s121_s12, %s245_s2 }
  0x26   :  { %p127_p4 = pnand %p125_p3, %p122_p2 }
  0x28   :  { %130 = shalt.err (!%p127_p4)
}
  0x29   :  { %s131_s18 = scalar_lea.vmem %s38_s9, 128  ;;  %p136_p6 = scmp.lt.s32.totalorder %s38_s9, %s38_s9 }
  0x2a   :  { %p132_p5 = scmp.ne.s32.totalorder %s38_s9, %s131_s18  ;;  %p137_p7 = scmp.lt.s32.totalorder %s131_s18, %s131_s18 }
  0x2c   :  { %p138_p8 = por %p137_p7, %p136_p6 }
  0x2e   :  { %p139_p9 = pnand %p138_p8, %p132_p5 }
  0x30   :  { %142 = shalt.err (!%p139_p9)
}
  0x31   :  { %40 = dma.hbm_to_vmem [thread:$0]  %s245_s2, 128, %s38_s9, [#allocation6]  }
  0x32   :  { %165 = dma.done.wait [#allocation3], 128  }
  0x33   :  { %166 = vsyncadd [#allocation3], 4294967168 }
  0x34   :  { %167 = dma.done.wait [#allocation6], 256  }
  0x35   :  { %168 = vsyncadd [#allocation6], 4294967040  ;;  %v50_v0 = vld [vmem:[#allocation2] sm:$0xff]  ;;  %v51_v1 = vld [vmem:[#allocation5] sm:$0xff]  ;;  %s174_s19 = smov [#allocation8]  }
  0x36   :  { %v53_v2 = vld [vmem:[#allocation7] sm:$0xff]  ;;  %v52_v3 = vsub.f32 %v50_v0, %v51_v1  ;;  %s63_s20 = sshll.u32 %s174_s19, 4  ;;  %s64_s20 = int_to_ptr.vmem [resolvable:$true] %s63_s20 }
  0x37   :  { %s143_s21 = scalar_lea.vmem %s64_s20, 128  ;;  %p148_p11 = scmp.lt.s32.totalorder %s64_s20, %s64_s20 }
  0x38   :  { %v54_v4 = vsub.f32 %v52_v3, %v53_v2  ;;  %p144_p10 = scmp.ne.s32.totalorder %s64_s20, %s143_s21  ;;  %p149_p12 = scmp.lt.s32.totalorder %s143_s21, %s143_s21 }
  0x3a   :  { %v55_v5 = vmax.f32 %v54_v4, 0.0  ;;  %p150_p13 = por %p149_p12, %p148_p11 }
  0x3c   :  { %56 = vst [vmem:[#allocation8] sm:$0xff] %v55_v5  ;;  %p151_p0 = pnand %p150_p13, %p144_p10 }
  0x3e   :  { %154 = shalt.err (!%p151_p0)
}
  0x3f   :  { %s155_s23 = scalar_lea.hbm %s246_s3, 128 }
  0x40   :  { %p156_p1 = scmp.ne.s32.totalorder %s246_s3, %s155_s23  ;;  %p159_p2 = scmp.lt.u32.totalorder %s155_s23, %s246_s3 }
  0x42   :  { %p161_p3 = pnand %p159_p2, %p156_p1 }
  0x44   :  { %164 = shalt.err (!%p161_p3)
}
  0x45   :  { %66 = dma.vmem_to_hbm [thread:$0]  %s64_s20, 128, %s246_s3, [#allocation4]  }
  0x46   :  { %169 = dma.done.wait [#allocation4], 128  }
  0x47   :  { %170 = vsyncadd [#allocation4], 4294967168 }
  0x48   :  { %70 = vsyncpa [#allocation3], 1 }
  0x49   :  { %71 = vsyncpa [#allocation6], 1 }
  0x4a   :  { %72 = vsyncpa [#allocation4], 1 }

</bundles_post_ra>
